<compile_context>
chip_gen: v7x
topology: tpu7x:2x2x1
jax: 0.10.0
libtpu: 0.0.40
codegen_flags: <defaults>
</compile_context>

<pallas_src>
import functools

import jax
import jax.numpy as jnp
from jax.experimental import pallas as pl
from jax.experimental.pallas import tpu as pltpu

_VMEM = pl.BlockSpec(memory_space=pltpu.MemorySpace.VMEM)
_TM_MAX = 512         # rows per matmul tile (bf16 A tile <= 512*1024*2B = 1 MiB)
_RED_ROWS_MAX = 1024  # rows (x128 lanes) per reduction tile (f32, 512 KiB)


def _round_up(x, m):
    return ((x + m - 1) // m) * m


# ----------------------------------------------------------------------------
# Pallas kernels
# ----------------------------------------------------------------------------
def _matmul_bias_act_kernel(a_ref, w_ref, b_ref, o_ref, *, leaky_slope):
    # bf16 x bf16 on the MXU, f32 accumulate; epilogue (bias + LeakyReLU) in
    # f32, cast on store (bf16 for intermediate layers, f32 for logits).
    y = jnp.dot(a_ref[...], w_ref[...], preferred_element_type=jnp.float32)
    y = y + b_ref[...]
    if leaky_slope is not None:
        y = jnp.where(y >= 0.0, y, leaky_slope * y)
    o_ref[...] = y.astype(o_ref.dtype)


def _mean_abs_diff_kernel(a_ref, b_ref, o_ref, *, inv_n):
    # Grid-tiled reduction: (1,1) output block is resident across the
    # "arbitrary" axis and used as the accumulator (P3 pattern).
    @pl.when(pl.program_id(0) == 0)
    def _():
        o_ref[...] = jnp.zeros_like(o_ref)

    o_ref[...] += jnp.sum(jnp.abs(a_ref[...] - b_ref[...]))

    @pl.when(pl.program_id(0) == pl.num_programs(0) - 1)
    def _():
        o_ref[...] = o_ref[...] * inv_n


def _gen_scalars_kernel(cb_ref, lf_ref, cb_out, g_out):
    cb_out[0, 0] = jnp.mean(cb_ref[...])          # codebook_loss.mean()
    g_out[0, 0] = -jnp.mean(lf_ref[...])          # hinge_g_loss(logits_fake)


def _disc_scalars_kernel(lr_ref, lf_ref, d_out, mr_out, mf_out):
    lr = lr_ref[...]
    lf = lf_ref[...]
    d_out[0, 0] = 0.5 * (jnp.mean(jnp.maximum(1.0 - lr, 0.0))
                         + jnp.mean(jnp.maximum(1.0 + lf, 0.0)))  # hinge_d_loss
    mr_out[0, 0] = jnp.mean(lr)
    mf_out[0, 0] = jnp.mean(lf)


# ----------------------------------------------------------------------------
# Pallas wrappers
# ----------------------------------------------------------------------------
def pallas_matmul_bias_act(a_bf16, w_bf16, bias_f32, leaky_slope=None,
                           out_dtype=jnp.float32):
    """A:(M,K) bf16  x  W:(K,N) bf16  + bias:(1,N) f32, optional LeakyReLU.

    Grid-tiled over M (parallel axis -> megacore sharding on v7x); W and bias
    are full-array VMEM-resident blocks (K*N is small for a PatchGAN disc).
    """
    M, K = a_bf16.shape
    _, N = w_bf16.shape
    tm = min(_TM_MAX, _round_up(M, 8))
    Mp = _round_up(M, tm)
    if Mp != M:
        a_bf16 = jnp.pad(a_bf16, ((0, Mp - M), (0, 0)))
    grid = (Mp // tm,)

    out_bytes = jnp.dtype(out_dtype).itemsize
    # Double-buffered tiles: 2x A-tile + 2x W + 2x out-tile + 2x bias (+headroom).
    tile_bytes = (2 * (tm * K * 2) + 2 * (K * N * 2)
                  + 2 * (tm * N * out_bytes) + 2 * (N * 4))
    vmem_limit = int(tile_bytes) + (8 << 20)
    cost = pl.CostEstimate(
        flops=2 * Mp * K * N,
        transcendentals=0,
        bytes_accessed=Mp * K * 2 + K * N * 2 + N * 4 + Mp * N * out_bytes)

    out = pl.pallas_call(
        functools.partial(_matmul_bias_act_kernel, leaky_slope=leaky_slope),
        out_shape=jax.ShapeDtypeStruct((Mp, N), out_dtype),
        grid_spec=pltpu.PrefetchScalarGridSpec(
            num_scalar_prefetch=0,
            grid=grid,
            in_specs=[pl.BlockSpec((tm, K), lambda i: (i, 0)),
                      pl.BlockSpec((K, N), lambda i: (0, 0)),
                      pl.BlockSpec((1, N), lambda i: (0, 0))],
            out_specs=pl.BlockSpec((tm, N), lambda i: (i, 0))),
        compiler_params=pltpu.CompilerParams(
            dimension_semantics=("parallel",),
            vmem_limit_bytes=vmem_limit),
        cost_estimate=cost,
    )(a_bf16, w_bf16, bias_f32)
    if Mp != M:
        out = out[:M]
    return out


def pallas_mean_abs_diff(a, b):
    """mean(|a - b|) over all elements, grid-tiled with a resident accumulator."""
    n = int(a.size)
    af = a.reshape(-1).astype(jnp.float32)
    bf = b.reshape(-1).astype(jnp.float32)
    rows = min(_RED_ROWS_MAX, _round_up(-(-n // 128), 8))
    blk = rows * 128
    n_pad = _round_up(n, blk)
    if n_pad != n:
        af = jnp.pad(af, (0, n_pad - n))   # padded a==b==0 -> contributes 0
        bf = jnp.pad(bf, (0, n_pad - n))
    a2 = af.reshape(-1, 128)
    b2 = bf.reshape(-1, 128)
    grid = (n_pad // blk,)

    out = pl.pallas_call(
        functools.partial(_mean_abs_diff_kernel, inv_n=1.0 / float(n)),
        out_shape=jax.ShapeDtypeStruct((1, 1), jnp.float32),
        grid_spec=pltpu.PrefetchScalarGridSpec(
            num_scalar_prefetch=0,
            grid=grid,
            in_specs=[pl.BlockSpec((rows, 128), lambda i: (i, 0)),
                      pl.BlockSpec((rows, 128), lambda i: (i, 0))],
            out_specs=pl.BlockSpec((1, 1), lambda i: (0, 0))),
        compiler_params=pltpu.CompilerParams(
            dimension_semantics=("arbitrary",)),
    )(a2, b2)
    return out[0, 0]


def pallas_gen_scalars(codebook_loss, logits_fake):
    """Fused: (codebook_loss.mean(), hinge_g_loss(logits_fake)). Tiny inputs."""
    cb = jnp.atleast_1d(codebook_loss).reshape(1, -1).astype(jnp.float32)
    lf = logits_fake.reshape(1, -1).astype(jnp.float32)
    cb_m, g = pl.pallas_call(
        _gen_scalars_kernel,
        out_shape=(jax.ShapeDtypeStruct((1, 1), jnp.float32),
                   jax.ShapeDtypeStruct((1, 1), jnp.float32)),
        in_specs=[_VMEM, _VMEM],
        out_specs=(_VMEM, _VMEM),
    )(cb, lf)
    return cb_m[0, 0], g[0, 0]


def pallas_disc_scalars(logits_real, logits_fake):
    """Fused: (hinge_d_loss, logits_real.mean(), logits_fake.mean())."""
    lr = logits_real.reshape(1, -1).astype(jnp.float32)
    lf = logits_fake.reshape(1, -1).astype(jnp.float32)
    d, mr, mf = pl.pallas_call(
        _disc_scalars_kernel,
        out_shape=(jax.ShapeDtypeStruct((1, 1), jnp.float32),
                   jax.ShapeDtypeStruct((1, 1), jnp.float32),
                   jax.ShapeDtypeStruct((1, 1), jnp.float32)),
        in_specs=[_VMEM, _VMEM],
        out_specs=(_VMEM, _VMEM, _VMEM),
    )(lr, lf)
    return d[0, 0], mr[0, 0], mf[0, 0]


# ----------------------------------------------------------------------------
# Discriminator (PatchGAN / NLayerDiscriminator-style), NHWC conv-as-matmul
# ----------------------------------------------------------------------------
def _im2col_nhwc(x, k, stride, pad):
    """x: (B, H, W, C) -> (B*OH*OW, k*k*C); column order (kh major, kw, c minor)."""
    B, H, W, C = x.shape
    xp = jnp.pad(x, ((0, 0), (pad, pad), (pad, pad), (0, 0)))
    OH = (H + 2 * pad - k) // stride + 1
    OW = (W + 2 * pad - k) // stride + 1
    cols = []
    for ki in range(k):
        for kj in range(k):
            cols.append(
                xp[:, ki:ki + stride * OH:stride, kj:kj + stride * OW:stride, :]
            )  # (B, OH, OW, C)
    cols = jnp.stack(cols, axis=3)                       # (B, OH, OW, k*k, C)
    a = cols.reshape(B * OH * OW, k * k * C)
    return a, OH, OW


def _conv2d_nhwc_pallas(x, w_mm, bias, stride, pad, leaky_slope=None,
                        out_dtype=jnp.bfloat16):
    """Conv2d on NHWC input via im2col + Pallas bf16 matmul (bias/act fused)."""
    B = x.shape[0]
    K, OC = w_mm.shape
    a, OH, OW = _im2col_nhwc(x, 4, stride, pad)
    if a.dtype != jnp.bfloat16:
        a = a.astype(jnp.bfloat16)
    y = pallas_matmul_bias_act(a, w_mm, bias, leaky_slope, out_dtype=out_dtype)
    return y.reshape(B, OH, OW, OC)                       # stay NHWC


def init_discriminator_params(key, input_nc=3, ndf=16, n_layers=2):
    """weights_init semantics: Conv ~ N(0, 0.02); BN gamma ~ N(1, 0.02), beta=0.

    Weights are pre-folded (eval-mode BN) and pre-laid-out as bf16 (K, OC)
    matmul operands with K ordered (kh, kw, c) to match _im2col_nhwc.
    """
    params = []
    keys = jax.random.split(key, 16)
    ki = 0

    def conv_w(k, oc, c):
        return 0.02 * jax.random.normal(k, (oc, c, 4, 4), jnp.float32)

    def to_mm(w):  # (OC, C, KH, KW) -> (KH*KW*C, OC) bf16
        OC, C, KH, KW = w.shape
        return w.transpose(2, 3, 1, 0).reshape(KH * KW * C, OC).astype(jnp.bfloat16)

    # layer 0: conv(input_nc -> ndf, s=2), bias, LeakyReLU(0.2)
    w0 = conv_w(keys[ki], ndf, input_nc); ki += 1
    params.append(dict(w=to_mm(w0), b=jnp.zeros((1, ndf), jnp.float32),
                       stride=2, act=0.2))
    # intermediate layers: conv (no bias) + eval-mode BatchNorm folded into weights
    nf_prev, nf = ndf, ndf
    eps = 1e-5
    for n in range(1, n_layers + 1):
        nf_prev, nf = nf, ndf * min(2 ** n, 8)
        stride = 2 if n < n_layers else 1
        w = conv_w(keys[ki], nf, nf_prev); ki += 1
        gamma = 1.0 + 0.02 * jax.random.normal(keys[ki], (nf,), jnp.float32); ki += 1
        scale = gamma / jnp.sqrt(1.0 + eps)   # running_mean=0, running_var=1
        params.append(dict(w=to_mm(w * scale[:, None, None, None]),
                           b=jnp.zeros((1, nf), jnp.float32), stride=stride, act=0.2))
    # final 1-channel conv, s=1, with bias, no activation
    wl = conv_w(keys[ki], 1, nf); ki += 1
    params.append(dict(w=to_mm(wl), b=jnp.zeros((1, 1), jnp.float32),
                       stride=1, act=None))
    return params


def discriminator_forward(params, x_nchw):
    # single NCHW -> NHWC transpose + bf16 cast; everything downstream is
    # channels-last bf16 until the final f32 logits.
    h = jnp.transpose(x_nchw, (0, 2, 3, 1)).astype(jnp.bfloat16)
    n_layers = len(params)
    for li, p in enumerate(params):
        out_dtype = jnp.float32 if li == n_layers - 1 else jnp.bfloat16
        h = _conv2d_nhwc_pallas(h, p["w"], p["b"], stride=p["stride"], pad=1,
                                leaky_slope=p["act"], out_dtype=out_dtype)
    return h  # (B, H', W', 1) patch logits (NHWC, f32)


# ----------------------------------------------------------------------------
# VQLPIPSWithDiscriminator (JAX / Pallas)
# ----------------------------------------------------------------------------
class VQLPIPSWithDiscriminator:
    def __init__(self, disc_start, disc_params, codebook_weight=1.0,
                 pixelloss_weight=1.0, disc_factor=1.0, disc_weight=1.0,
                 perceptual_weight=0.0, disc_conditional=False,
                 disc_adaptive_loss=False, disc_loss="hinge",
                 disc_weight_max=1.0):
        assert disc_loss == "hinge"
        self.codebook_weight = codebook_weight
        self.pixel_weight = pixelloss_weight
        self.perceptual_weight = perceptual_weight
        self.discriminator_iter_start = disc_start
        self.disc_params = disc_params
        self.disc_factor = disc_factor
        self.discriminator_weight = disc_weight
        self.disc_conditional = disc_conditional
        self.disc_adaptive_loss = disc_adaptive_loss
        self.disc_weight_max = disc_weight_max

    def forward(self, codebook_loss, inputs, reconstructions, optimizer_idx,
                global_step, split="train"):
        # rec_loss = |inputs - reconstructions|; nll_loss = rec_loss.mean()
        # (perceptual_weight == 0 -> p_loss = [0.0], rec_loss unchanged)
        nll_loss = pallas_mean_abs_diff(inputs, reconstructions)
        rec_loss_mean = nll_loss
        p_loss = jnp.array([0.0], jnp.float32)

        # Python comparison (global_step is a plain int here, as in the demo).
        # Under jit with a traced step this would need jnp.where/lax.select.
        disc_factor = self.disc_factor if global_step >= self.discriminator_iter_start else 0.0

        if optimizer_idx == 0:
            logits_fake = discriminator_forward(self.disc_params, reconstructions)
            cb_mean, g_loss = pallas_gen_scalars(codebook_loss, logits_fake)
            # disc_adaptive_loss=False branch of the reference module:
            d_weight = jnp.asarray(self.disc_weight_max, jnp.float32)
            loss = nll_loss + d_weight * disc_factor * g_loss + self.codebook_weight * cb_mean
            log = {
                f"{split}_total_loss": loss,
                f"{split}_quant_loss": cb_mean,
                f"{split}_nll_loss": nll_loss,
                f"{split}_rec_loss": rec_loss_mean,
                f"{split}_p_loss": p_loss,
                f"{split}_d_weight": d_weight,
                f"{split}_disc_factor": jnp.asarray(disc_factor, jnp.float32),
                f"{split}_g_loss": g_loss,
            }
            return loss, log

        if optimizer_idx == 1:
            # Run the discriminator once on 2B (real || fake), then split.
            B = inputs.shape[0]
            x_cat = jnp.concatenate(
                [jax.lax.stop_gradient(inputs),
                 jax.lax.stop_gradient(reconstructions)], axis=0)
            logits = discriminator_forward(self.disc_params, x_cat)
            logits_real, logits_fake = logits[:B], logits[B:]
            d_raw, mean_real, mean_fake = pallas_disc_scalars(logits_real, logits_fake)
            d_loss = disc_factor * d_raw
            log = {
                f"{split}_disc_loss": d_loss,
                f"{split}_logits_real": mean_real,
                f"{split}_logits_fake": mean_fake,
            }
            return d_loss, log

        raise ValueError("optimizer_idx must be 0 or 1")


# ----------------------------------------------------------------------------
# Demo
# ----------------------------------------------------------------------------
if __name__ == "__main__":
    key = jax.random.PRNGKey(0)
    k_in, k_rec, k_cb, k_disc = jax.random.split(key, 4)

    B, C, H, W = 2, 3, 16, 16
    inputs = jax.random.normal(k_in, (B, C, H, W), jnp.float32)
    reconstructions = inputs + 0.1 * jax.random.normal(k_rec, (B, C, H, W), jnp.float32)
    codebook_loss = jnp.abs(jax.random.normal(k_cb, (B,), jnp.float32))

    disc_params = init_discriminator_params(k_disc, input_nc=C, ndf=16, n_layers=2)
    criterion = VQLPIPSWithDiscriminator(disc_start=0, disc_params=disc_params,
                                         codebook_weight=1.0, disc_factor=1.0,
                                         disc_weight=1.0, disc_weight_max=1.0)

    # generator step
    loss0, log0 = criterion.forward(codebook_loss, inputs, reconstructions,
                                    optimizer_idx=0, global_step=100)
    # discriminator step
    loss1, log1 = criterion.forward(codebook_loss, inputs, reconstructions,
                                    optimizer_idx=1, global_step=100)

    jax.block_until_ready((loss0, log0, loss1, log1))
    print("KERNEL_OK")
</pallas_src>

<mosaic_0001>
module attributes {stable_mosaic.version = 11 : i64} {
  func.func @_mean_abs_diff_kernel(%arg0: i32, %arg1: memref<16x128xf32, #tpu.memory_space<vmem>>, %arg2: memref<16x128xf32, #tpu.memory_space<vmem>>, %arg3: memref<1x1xf32, #tpu.memory_space<vmem>>) attributes {dimension_semantics = [#tpu.dimension_semantics<arbitrary>], iteration_bounds = array<i64: 1>, scalar_prefetch = 0 : i64, scratch_operands = 0 : i64, tpu.core_type = #tpu.core_type<tc>, window_params = [{transform_indices = @transform_0, window_bounds = array<i64: 16, 128>}, {transform_indices = @transform_1, window_bounds = array<i64: 16, 128>}, {pipeline_mode = #tpu.pipeline_mode<synchronous>, transform_indices = @transform_2, window_bounds = array<i64: 1, 1>}]} {
    %c0_i32 = arith.constant 0 : i32
    %0 = arith.cmpi eq, %arg0, %c0_i32 : i32
    %1 = arith.extui %0 : i1 to i32
    %c0_i32_0 = arith.constant 0 : i32
    %2 = arith.cmpi ne, %1, %c0_i32_0 : i32
    scf.if %2 {
      %cst_10 = arith.constant 0.000000e+00 : f32
      %18 = vector.broadcast %cst_10 : f32 to vector<1x1xf32>
      %c0_11 = arith.constant 0 : index
      %c0_12 = arith.constant 0 : index
      %19 = vector.load %arg3[%c0_11, %c0_12] : memref<1x1xf32, #tpu.memory_space<vmem>>, vector<1x1xf32>
      tpu.vector_store %arg3[%c0_11, %c0_12], %18 {strides = array<i32>} : memref<1x1xf32, #tpu.memory_space<vmem>>, vector<1x1xf32>,
    } else {
    }
    %c0 = arith.constant 0 : index
    %c0_1 = arith.constant 0 : index
    %3 = vector.load %arg3[%c0, %c0_1] : memref<1x1xf32, #tpu.memory_space<vmem>>, vector<1x1xf32>
    %c0_2 = arith.constant 0 : index
    %c0_3 = arith.constant 0 : index
    %4 = vector.load %arg1[%c0_2, %c0_3] : memref<16x128xf32, #tpu.memory_space<vmem>>, vector<16x128xf32>
    %c0_4 = arith.constant 0 : index
    %c0_5 = arith.constant 0 : index
    %5 = vector.load %arg2[%c0_4, %c0_5] : memref<16x128xf32, #tpu.memory_space<vmem>>, vector<16x128xf32>
    %6 = arith.subf %4, %5 : vector<16x128xf32>
    %7 = math.absf %6 : vector<16x128xf32>
    %8 = vector.shape_cast %7 : vector<16x128xf32> to vector<1x16x128xf32>
    %cst = arith.constant dense<0.000000e+00> : vector<1xf32>
    %9 = vector.multi_reduction <add>, %8, %cst [1, 2] : vector<1x16x128xf32> to vector<1xf32>
    %10 = vector.shape_cast %9 : vector<1xf32> to vector<1x1x1xf32>
    %11 = vector.extract %10[0, 0, 0] : f32 from vector<1x1x1xf32>
    %12 = vector.broadcast %11 : f32 to vector<1x1xf32>
    %13 = arith.addf %3, %12 : vector<1x1xf32>
    %c0_6 = arith.constant 0 : index
    %c0_7 = arith.constant 0 : index
    %14 = vector.load %arg3[%c0_6, %c0_7] : memref<1x1xf32, #tpu.memory_space<vmem>>, vector<1x1xf32>
    tpu.vector_store %arg3[%c0_6, %c0_7], %13 {strides = array<i32>} : memref<1x1xf32, #tpu.memory_space<vmem>>, vector<1x1xf32>,
    %c0_i32_8 = arith.constant 0 : i32
    %15 = arith.cmpi eq, %arg0, %c0_i32_8 : i32
    %16 = arith.extui %15 : i1 to i32
    %c0_i32_9 = arith.constant 0 : i32
    %17 = arith.cmpi ne, %16, %c0_i32_9 : i32
    scf.if %17 {
      %c0_10 = arith.constant 0 : index
      %c0_11 = arith.constant 0 : index
      %18 = vector.load %arg3[%c0_10, %c0_11] : memref<1x1xf32, #tpu.memory_space<vmem>>, vector<1x1xf32>
      %cst_12 = arith.constant 6.51041686E-4 : f32
      %19 = vector.broadcast %cst_12 : f32 to vector<1x1xf32>
      %20 = arith.mulf %18, %19 : vector<1x1xf32>
      %c0_13 = arith.constant 0 : index
      %c0_14 = arith.constant 0 : index
      %21 = vector.load %arg3[%c0_13, %c0_14] : memref<1x1xf32, #tpu.memory_space<vmem>>, vector<1x1xf32>
      tpu.vector_store %arg3[%c0_13, %c0_14], %20 {strides = array<i32>} : memref<1x1xf32, #tpu.memory_space<vmem>>, vector<1x1xf32>,
    } else {
    }
    return
  }
  func.func @transform_0(%arg0: i32) -> (i32, i32) {
    %c0_i32 = arith.constant 0 : i32
    %c0_i32_0 = arith.constant 0 : i32
    return %arg0, %c0_i32 : i32, i32
  }
  func.func @transform_1(%arg0: i32) -> (i32, i32) {
    %c0_i32 = arith.constant 0 : i32
    %c0_i32_0 = arith.constant 0 : i32
    return %arg0, %c0_i32 : i32, i32
  }
  func.func @transform_2(%arg0: i32) -> (i32, i32) {
    %c0_i32 = arith.constant 0 : i32
    %c0_i32_0 = arith.constant 0 : i32
    %c0_i32_1 = arith.constant 0 : i32
    return %c0_i32, %c0_i32_0 : i32, i32
  }
}

</mosaic_0001>

<bundles_post_ra>
// kernel: tpu_custom_call.1
= control target key start
LH: loop header
LB: loop body
LE: loop exit
PB: predicated region body
PF: predicated region fallthrough
CT: control target
= control target key end

     0   :  { %7 = vsyncpa [#allocation3], 0  ;;  %s231_s0 = inlined_call_operand.hbm [shape: f32[16,128], index: 0, kind: input, shape index: {}]   ;;  %s232_s1 = inlined_call_operand.hbm [shape: f32[16,128], index: 1, kind: input, shape index: {}]   ;;  %s233_s2 = inlined_call_operand.hbm [shape: f32[1,1], index: 2, kind: output, shape index: {}]  }
   0x1   :  { %8 = vsyncpa [#allocation6], 0 }
   0x2   :  { %9 = vsyncpa [#allocation4], 0  ;;  %s171_s9 = smov [#allocation2]   ;;  %s99_s13 = scalar_lea.hbm %s231_s0, 256 }
   0x3   :  { %s15_s10 = sshll.u32 %s171_s9, 4  ;;  %p100_p0 = scmp.ne.s32.totalorder %s231_s0, %s99_s13  ;;  %s16_s10 = int_to_ptr.vmem [resolvable:$true] %s15_s10 }
   0x4   :  { %p103_p1 = scmp.lt.u32.totalorder %s99_s13, %s231_s0 }
   0x6   :  { %p105_p2 = pnand %p103_p1, %p100_p0 }
   0x8   :  { %108 = shalt.err (!%p105_p2)
}
   0x9   :  { %s109_s18 = scalar_lea.vmem %s16_s10, 256  ;;  %p114_p4 = scmp.lt.s32.totalorder %s16_s10, %s16_s10 }
   0xa   :  { %p110_p3 = scmp.ne.s32.totalorder %s16_s10, %s109_s18  ;;  %p115_p5 = scmp.lt.s32.totalorder %s109_s18, %s109_s18 }
   0xc   :  { %p116_p6 = por %p115_p5, %p114_p4 }
   0xe   :  { %p117_p7 = pnand %p116_p6, %p110_p3 }
  0x10   :  { %120 = shalt.err (!%p117_p7)
}
  0x11   :  { %s172_s19 = smov 128   ;;  %s173_s20 = smov 8  }
  0x12   :  { %21 = dma.hbm_to_vmem [thread:$0]  %s231_s0, 256, %s16_s10, [#allocation3], %s172_s19, %s172_s19, %s173_s20  }
  0x13   :  { %s174_s23 = smov [#allocation5]   ;;  %s121_s27 = scalar_lea.hbm %s232_s1, 256 }
  0x14   :  { %s27_s24 = sshll.u32 %s174_s23, 4  ;;  %p122_p8 = scmp.ne.s32.totalorder %s232_s1, %s121_s27  ;;  %s28_s24 = int_to_ptr.vmem [resolvable:$true] %s27_s24 }
  0x15   :  { %p125_p9 = scmp.lt.u32.totalorder %s121_s27, %s232_s1 }
  0x17   :  { %p127_p10 = pnand %p125_p9, %p122_p8 }
  0x19   :  { %130 = shalt.err (!%p127_p10)
}
  0x1a   :  { %s131_s4 = scalar_lea.vmem %s28_s24, 256  ;;  %p136_p12 = scmp.lt.s32.totalorder %s28_s24, %s28_s24 }
  0x1b   :  { %p132_p11 = scmp.ne.s32.totalorder %s28_s24, %s131_s4  ;;  %p137_p13 = scmp.lt.s32.totalorder %s131_s4, %s131_s4 }
  0x1d   :  { %p138_p0 = por %p137_p13, %p136_p12 }
  0x1f   :  { %p139_p1 = pnand %p138_p0, %p132_p11 }
  0x21   :  { %142 = shalt.err (!%p139_p1)
}
  0x22   :  { %33 = dma.hbm_to_vmem [thread:$0]  %s232_s1, 256, %s28_s24, [#allocation6], %s172_s19, %s172_s19, %s173_s20  }
  0x23   :  { %165 = dma.done.wait [#allocation3], 256  }
  0x24   :  { %166 = vsyncadd [#allocation3], 4294967040 }
  0x25   :  { %167 = dma.done.wait [#allocation6], 256  }
  0x26   :  { %168 = vsyncadd [#allocation6], 4294967040  ;;  %v47_v0 = vld [vmem:[#allocation2] sm:$0xff]  ;;  %v48_v1 = vld [vmem:[#allocation2 + $0x8] sm:$0xff]  ;;  %vm44_vm0 = vcmask 0   ;;  %v175_v9 = vmov 0.0  }
  0x27   :  { %v49_v2 = vld [vmem:[#allocation5] sm:$0xff]  ;;  %v50_v3 = vld [vmem:[#allocation5 + $0x8] sm:$0xff]  ;;  %45 = vst.msk [vmem:[#allocation7] sm:$0x1] %vm44_vm0, %v175_v9  ;;  %s176_s6 = smov [#allocation7]  }
  0x28   :  { %v51_v4 = vsub.f32 %v47_v0, %v49_v2  ;;  %v52_v5 = vsub.f32 %v48_v1, %v50_v3  ;;  %s81_s7 = sshll.u32 %s176_s6, 4  ;;  %s82_s7 = int_to_ptr.vmem [resolvable:$true] %s81_s7 }
  0x29   :  { %s143_s8 = scalar_lea.vmem %s82_s7, 16  ;;  %s147_s9 = scalar_lea.vmem %s82_s7, 32 }
  0x2a   :  { %v53_v6 = vand.u32 2147483647, %v51_v4  ;;  %v54_v7 = vand.u32 2147483647, %v52_v5  ;;  %p144_p2 = scmp.ne.s32.totalorder %s82_s7, %s143_s8  ;;  %p148_p3 = scmp.lt.s32.totalorder %s82_s7, %s82_s7 }
  0x2b   :  { %p149_p4 = scmp.lt.s32.totalorder %s147_s9, %s143_s8 }
  0x2c   :  { %v55_v8 = vadd.f32 %v54_v7, %v53_v6 }
  0x2d   :  { %p150_p5 = por %p149_p4, %p148_p3 }
  0x2e   :  { %56 = vadd.xlane.f32.xlu0 %v55_v8  ;;  %v46_v17 = vld [vmem:[#allocation7] sm:$0x1] }
  0x2f   :  { %p151_p6 = pnand %p150_p5, %p144_p2 }
  0xbb   :  { %v57_v10 = vpop.xlane.xlu0 %56 }
  0xbc   :  { %v58_v11 = vrot.slane %v57_v10, 4 }
  0xbe   :  { %v59_v12 = vadd.f32 %v58_v11, %v57_v10 }
  0xc0   :  { %v60_v13 = vrot.slane %v59_v12, 2 }
  0xc2   :  { %v61_v14 = vadd.f32 %v60_v13, %v59_v12 }
  0xc4   :  { %v62_v15 = vrot.slane %v61_v14, 1 }
  0xc6   :  { %v63_v16 = vadd.f32 %v62_v15, %v61_v14 }
  0xc8   :  { %91 = vpush %v63_v16 }
  0xf9   :  { %s92_s1 = spop %91 }
  0xfa   :  { %v65_v18 = vstv %s92_s1 }
  0xfb   :  { %v66_v19 = vadd.f32 %v65_v18, %v46_v17 }
  0xfd   :  { %68 = vst.msk [vmem:[#allocation7] sm:$0x1] %vm44_vm0, %v66_v19 }
 0x104   :  { %v72_v20 = vld [vmem:[#allocation7] sm:$0x1] }
 0x105   :  { %v73_v21 = vmul.f32 0.0006510417, %v72_v20 }
 0x107   :  { %74 = vst.msk [vmem:[#allocation7] sm:$0x1] %vm44_vm0, %v73_v21 }
 0x108   :  { %154 = shalt.err (!%p151_p6)
}
 0x109   :  { %s155_s12 = scalar_lea.hbm %s233_s2, 16 }
 0x10a   :  { %p156_p7 = scmp.ne.s32.totalorder %s233_s2, %s155_s12  ;;  %p159_p8 = scmp.lt.u32.totalorder %s155_s12, %s233_s2 }
 0x10c   :  { %p161_p9 = pnand %p159_p8, %p156_p7 }
 0x10e   :  { %164 = shalt.err (!%p161_p9)
}
 0x10f   :  { %84 = dma.vmem_to_hbm [thread:$0]  %s82_s7, 16, %s233_s2, [#allocation4]  }
 0x110   :  { %169 = dma.done.wait [#allocation4], 16  }
 0x111   :  { %170 = vsyncadd [#allocation4], 4294967280 }
 0x112   :  { %88 = vsyncpa [#allocation3], 1 }
 0x113   :  { %89 = vsyncpa [#allocation6], 1 }
 0x114   :  { %90 = vsyncpa [#allocation4], 1 }

</bundles_post_ra>
